<compile_context>
chip_gen: v5e
topology: v5e:2x2
jax: 0.10.0
libtpu: 0.0.40
codegen_flags: <defaults>
</compile_context>

<pallas_src>
import jax
import jax.numpy as jnp
from jax.experimental import pallas as pl
from jax.experimental.pallas import tpu as pltpu


def _matmul_kernel(x_ref, w_ref, o_ref):
    # x_ref: (r_t, g*K*C_in) bf16 | w_ref: (g*K*C_in, g*C_out) bf16 (grid-invariant)
    # o_ref: (r_t, g*C_out)  — single lane-dense MXU matmul per grid step.
    o_ref[...] = jnp.dot(
        x_ref[...], w_ref[...], preferred_element_type=jnp.float32
    ).astype(o_ref.dtype)


def _pick_row_tile(packed_rows, max_tile=2048):
    """Packed-row tile per grid step.

    Large fixed tile (amortizes the ~0.35 us per-grid-step overhead), capped so the grid has
    >= 2 steps whenever there is enough work (v7x has 2 TensorCores; the 'parallel' axis
    shards across them).  The grid uses pl.cdiv, so the tile does NOT have to divide the
    packed row count — the last partial block is clipped by Pallas.
    """
    if packed_rows >= 2 * max_tile:
        return max_tile
    # ceil(packed_rows / 2) rounded up to a full 8-row sublane tile.
    half = ((packed_rows + 15) // 16) * 8
    return max(8, half)


def local_embedding(x, weight, *, compute_dtype=jnp.bfloat16, out_dtype=None):
    """Pallas TPU LocalEmbedding forward.

    x: (B, L, C_in); weight: PyTorch Conv1d layout (C_out, C_in, K), bias=False.
    Returns (B, L, C_out) == Conv1d(C_in, C_out, K, padding='same', bias=False) along L.
    """
    B, L, C_in = x.shape
    C_out, C_in_w, K = weight.shape
    assert C_in_w == C_in
    # TODO(synk): PyTorch 'same' pads asymmetrically for even K; only odd K handled here.
    assert K % 2 == 1
    pad = (K - 1) // 2
    KC = K * C_in
    if out_dtype is None:
        out_dtype = x.dtype  # use jnp.bfloat16 here to halve output HBM bytes if tolerated

    xc = x.astype(compute_dtype)
    wc = weight.astype(compute_dtype)

    # --- im2col in the wrapper: x_win[b, l, t*C_in + ci] = x_pad[b, l + t, ci]. ---
    # (C_in is tiny so the K-fold input duplication is negligible next to the output bytes.)
    x_pad = jnp.pad(xc, ((0, 0), (pad, pad), (0, 0)))                        # (B, L+K-1, C_in)
    x_win = jnp.concatenate([x_pad[:, t:t + L, :] for t in range(K)], -1)    # (B, L, K*C_in)

    # Weight -> (K*C_in, C_out) with matching tap/channel order: w2[t*C_in+ci, co] = w[co,ci,t]
    w2 = jnp.transpose(wc, (2, 1, 0)).reshape(KC, C_out)

    # --- Lane packing for small C_out (kernel is output-HBM-bound): pack g consecutive
    # output rows along the 128-lane axis via a block-diagonal weight instead of zero-padding
    # C_out to 128.  One matmul emits a lane-dense (rows/g, g*C_out) block with no wasted
    # columns; the un-pack afterwards is a free contiguous reshape (no slicing pass).
    g = 128 // C_out if (C_out < 128 and 128 % C_out == 0) else 1
    rows = B * L
    x2 = x_win.reshape(rows, KC)

    # Rows must be a multiple of g for the packing reshape; also keep >= 8 packed rows
    # (one full sublane tile) so tiny problems never hit a fully-clipped block.
    rows_p = max(-(-rows // g) * g, 8 * g)
    if rows_p != rows:
        x2 = jnp.pad(x2, ((0, rows_p - rows), (0, 0)))
    packed_rows = rows_p // g
    x2 = x2.reshape(packed_rows, g * KC)

    if g > 1:
        eye = jnp.eye(g, dtype=compute_dtype)
        # w_bd[a*KC + k, b*C_out + c] = (a == b) * w2[k, c]  (block-diagonal)
        w_mat = jnp.einsum("ab,kc->akbc", eye, w2).reshape(g * KC, g * C_out)
    else:
        w_mat = w2  # C_out >= 128 (or awkward divisor): emit the unpadded full-width output

    r_t = _pick_row_tile(packed_rows)
    grid = (pl.cdiv(packed_rows, r_t),)

    out = pl.pallas_call(
        _matmul_kernel,
        out_shape=jax.ShapeDtypeStruct((packed_rows, g * C_out), out_dtype),
        grid=grid,
        in_specs=[
            pl.BlockSpec((r_t, g * KC), lambda i: (i, 0)),
            pl.BlockSpec((g * KC, g * C_out), lambda i: (0, 0)),  # grid-invariant (resident)
        ],
        out_specs=pl.BlockSpec((r_t, g * C_out), lambda i: (i, 0)),
        compiler_params=pltpu.CompilerParams(
            dimension_semantics=("parallel",),
        ),
    )(x2, w_mat)

    out = out.reshape(rows_p, C_out)
    if rows_p != rows:
        out = out[:rows]
    return out.reshape(B, L, C_out)


if __name__ == "__main__":
    # Small shapes implied by the module: batch=2, seq=16, n_vars=4, d_model=32, k_size=3
    B, L, n_vars, d_model, k_size = 2, 16, 4, 32, 3

    key = jax.random.PRNGKey(0)
    kx, kw = jax.random.split(key)
    x = jax.random.normal(kx, (B, L, n_vars), dtype=jnp.float32)
    # Deterministic synthetic Conv1d weight, PyTorch layout (C_out, C_in, K), bias=False.
    fan_in = n_vars * k_size
    bound = 1.0 / (fan_in ** 0.5)
    weight = jax.random.uniform(
        kw, (d_model, n_vars, k_size), minval=-bound, maxval=bound, dtype=jnp.float32
    )

    out = jax.block_until_ready(local_embedding(x, weight))
    assert out.shape == (B, L, d_model)

    # Reference: f32 lax conv in channels-last layout (== PyTorch Conv1d 'same', odd K).
    ref = jax.lax.conv_general_dilated(
        x,
        jnp.transpose(weight, (2, 1, 0)),  # (K, C_in, C_out) -> WIO
        window_strides=(1,),
        padding="SAME",
        dimension_numbers=("NWC", "WIO", "NWC"),
    )
    # The kernel computes in bf16 with f32 accumulation -> loose tolerance vs the f32 reference.
    assert jnp.allclose(out, ref, atol=3e-2, rtol=3e-2)

    print("KERNEL_OK")
</pallas_src>

<mosaic_0001>
module attributes {stable_mosaic.version = 11 : i64} {
  func.func @_matmul_kernel(%arg0: i32, %arg1: memref<8x48xbf16, #tpu.memory_space<vmem>>, %arg2: memref<48x128xbf16, #tpu.memory_space<vmem>>, %arg3: memref<8x128xf32, #tpu.memory_space<vmem>>) attributes {dimension_semantics = [#tpu.dimension_semantics<parallel>], iteration_bounds = array<i64: 1>, scalar_prefetch = 0 : i64, scratch_operands = 0 : i64, tpu.core_type = #tpu.core_type<tc>, window_params = [{transform_indices = @transform_0, window_bounds = array<i64: 8, 48>}, {pipeline_mode = #tpu.pipeline_mode<synchronous>, transform_indices = @transform_1, window_bounds = array<i64: 48, 128>}, {transform_indices = @transform_2, window_bounds = array<i64: 8, 128>}]} {
    %c0 = arith.constant 0 : index
    %c0_0 = arith.constant 0 : index
    %0 = vector.load %arg1[%c0, %c0_0] : memref<8x48xbf16, #tpu.memory_space<vmem>>, vector<8x48xbf16>
    %c0_1 = arith.constant 0 : index
    %c0_2 = arith.constant 0 : index
    %1 = vector.load %arg2[%c0_1, %c0_2] : memref<48x128xbf16, #tpu.memory_space<vmem>>, vector<48x128xbf16>
    %cst = arith.constant dense<0.000000e+00> : vector<8x128xf32>
    %2 = tpu.matmul %0, %1, %cst {dimension_numbers = #tpu.dot_dimension_numbers<[1], [0], [0], [1], [0, 0, 1, 1], [], []>} : vector<8x48xbf16>, vector<48x128xbf16>, vector<8x128xf32> -> vector<8x128xf32>
    %c0_3 = arith.constant 0 : index
    %c0_4 = arith.constant 0 : index
    %3 = vector.load %arg3[%c0_3, %c0_4] : memref<8x128xf32, #tpu.memory_space<vmem>>, vector<8x128xf32>
    tpu.vector_store %arg3[%c0_3, %c0_4], %2 {strides = array<i32>} : memref<8x128xf32, #tpu.memory_space<vmem>>, vector<8x128xf32>,
    return
  }
  func.func @transform_0(%arg0: i32) -> (i32, i32) {
    %c0_i32 = arith.constant 0 : i32
    %c0_i32_0 = arith.constant 0 : i32
    return %arg0, %c0_i32 : i32, i32
  }
  func.func @transform_1(%arg0: i32) -> (i32, i32) {
    %c0_i32 = arith.constant 0 : i32
    %c0_i32_0 = arith.constant 0 : i32
    %c0_i32_1 = arith.constant 0 : i32
    return %c0_i32, %c0_i32_0 : i32, i32
  }
  func.func @transform_2(%arg0: i32) -> (i32, i32) {
    %c0_i32 = arith.constant 0 : i32
    %c0_i32_0 = arith.constant 0 : i32
    return %arg0, %c0_i32 : i32, i32
  }
}

</mosaic_0001>

<bundles_post_ra>
// kernel: tpu_custom_call.1
= control target key start
LH: loop header
LB: loop body
LE: loop exit
PB: predicated region body
PF: predicated region fallthrough
CT: control target
= control target key end

     0   :  { %7 = vsyncpa [#allocation3], 0  ;;  %s232_s0 = inlined_call_operand.hbm [shape: bf16[8,48], index: 0, kind: input, shape index: {}]   ;;  %s233_s1 = inlined_call_operand.hbm [shape: bf16[48,128], index: 1, kind: input, shape index: {}]   ;;  %s234_s2 = inlined_call_operand.hbm [shape: f32[8,128], index: 2, kind: output, shape index: {}]  }
   0x1   :  { %8 = vsyncpa [#allocation6], 0 }
   0x2   :  { %9 = vsyncpa [#allocation4], 0  ;;  %s15_s11 = sshll.u32 %s232_s0, 4  ;;  %s203_s12 = smov [#allocation2]   ;;  %s16_s11 = int_to_ptr.hbm [resolvable:$true] %s15_s11 }
   0x3   :  { %s17_s13 = sshll.u32 %s203_s12, 4  ;;  %s25_s16 = sshll.u32 %s233_s1, 4  ;;  %s18_s13 = int_to_ptr.vmem [resolvable:$true] %s17_s13  ;;  %s26_s16 = int_to_ptr.hbm [resolvable:$true] %s25_s16 }
   0x4   :  { %20 = dma.hbm_to_vmem [thread:$0]  %s16_s11, 64, %s18_s13, [#allocation3]  }
   0x5   :  { %s204_s17 = smov [#allocation5]   ;;  %s205_s19 = smov 64  }
   0x6   :  { %s27_s18 = sshll.u32 %s204_s17, 4  ;;  %s206_s20 = smov 4   ;;  %s28_s18 = int_to_ptr.vmem [resolvable:$true] %s27_s18 }
   0x7   :  { %33 = dma.hbm_to_vmem [thread:$0]  %s26_s16, 384, %s28_s18, [#allocation6], %s205_s19, %s205_s19, %s206_s20  }
   0x8   :  { %197 = dma.done.wait [#allocation3], 64  }
   0x9   :  { %198 = vsyncadd [#allocation3], 4294967232 }
   0xa   :  { %199 = dma.done.wait [#allocation6], 384  }
   0xb   :  { %200 = vsyncadd [#allocation6], 4294966912  ;;  %v119_v0 = vld [vmem:[#allocation5 + $0x10] sm:$0xff]  ;;  %v118_v1 = vld [vmem:[#allocation5 + $0x8] sm:$0xff]  ;;  %vm68_vm0 = vcmask 392192   ;;  %s207_s0 = smov [#allocation7]  }
   0xc   :  { %77 = vmatpush.bf16.msra.mxu0 %v119_v0  ;;  %v117_v2 = vld [vmem:[#allocation5] sm:$0xff]  ;;  %v43_v3 = vld [vmem:[#allocation2] sm:$0xf]  ;;  %s91_s1 = sshll.u32 %s207_s0, 4  ;;  %s93_s23 = sshll.u32 %s234_s2, 4  ;;  %s92_s1 = int_to_ptr.vmem [resolvable:$true] %s91_s1  ;;  %s94_s23 = int_to_ptr.hbm [resolvable:$true] %s93_s23 }
  0x10   :  { %78 = vmatpush.bf16.msra.mxu0 %v118_v1 }
  0x14   :  { %79 = vmatpush.bf16.msra.mxu0 %v117_v2 }
  0x17   :  { %116 = vmatmul.msk.bf16.vlgmr.msra.gmra.mxu0 %vm68_vm0, %v43_v3 }
  0x94   :  { %v81_v4 = vpop.f32.mrf.mxu0 }
  0x95   :  { %85 = vst [vmem:[#allocation7] sm:$0xff] %v81_v4 }
  0x96   :  { %96 = dma.vmem_to_hbm [thread:$0]  %s92_s1, 128, %s94_s23, [#allocation4]  }
  0x9c   :  { %v83_v5 = vpop.f32.mrf.mxu0 }
  0x9d   :  { %201 = dma.done.wait [#allocation4], 128  }
  0x9e   :  { %202 = vsyncadd [#allocation4], 4294967168 }
  0x9f   :  { %101 = vsyncpa [#allocation3], 1 }
  0xa0   :  { %102 = vsyncpa [#allocation6], 1 }
  0xa1   :  { %103 = vsyncpa [#allocation4], 1 }

</bundles_post_ra>
